<compile_context>
chip_gen: v5e
topology: v5e:2x2
jax: 0.10.0
libtpu: 0.0.40
codegen_flags: <defaults>
</compile_context>

<pallas_src>
import functools

import jax
import jax.numpy as jnp
from jax.experimental import pallas as pl
from jax.experimental.pallas import tpu as pltpu


def _round_up(a: int, m: int) -> int:
    return (a + m - 1) // m * m


def _vmem_capacity_bytes() -> int:
    try:
        return int(pltpu.get_tpu_info().vmem_capacity_bytes)
    except Exception:
        return 64 << 20          # conservative default (v7x per-TensorCore)


# --------------------------- fused single-pass path ---------------------------

def _fused_kernel(x_ref, w_ref, b_ref, alpha_ref, o_ref, *, inv_t):
    """One batch row (1, C, T) resident in VMEM: mean -> FC -> sigmoid -> apply."""
    xf = x_ref[...].astype(jnp.float32)                              # (1, C, T)
    # Mean over time kept in column layout (C on sublanes, 1 lane) so the gate
    # never needs a lane<->sublane relayout before the broadcast apply.
    mean = jnp.sum(xf, axis=-1, keepdims=True)[0] * inv_t            # (C, 1)
    z = jnp.dot(w_ref[...], mean,
                preferred_element_type=jnp.float32) + b_ref[...]     # (C, 1)
    gate = 1.0 / (1.0 + jnp.exp(-z))                                 # (C, 1)
    o_ref[...] = ((x_ref[...].astype(jnp.float32) + alpha_ref[...])
                  * gate[None, :, :]).astype(o_ref.dtype)


# ------------------------------ two-pass fallback ------------------------------

def _sum_kernel(x_ref, sum_ref, acc_ref, *, t_total, tile_t):
    """Per-(b, c) time sums, streamed in lane-dense tiles; VPU-only accumulation."""
    j = pl.program_id(1)

    @pl.when(j == 0)
    def _():
        acc_ref[...] = jnp.zeros_like(acc_ref)

    xf = x_ref[...].astype(jnp.float32)                              # (1, C, tile_t)
    # Mask the ragged tail of the last tile (out-of-bounds lanes are undefined).
    lane = jax.lax.broadcasted_iota(jnp.int32, xf.shape, 2)
    xf = jnp.where(lane < (t_total - j * tile_t), xf, 0.0)

    # Lane-partial accumulation into (1, C, 128): pure VPU adds per tile; the
    # single cross-lane (XLU) reduce happens only once, on the last tile.
    acc = acc_ref[...]
    for k in range(tile_t // 128):
        acc = acc + xf[:, :, k * 128:(k + 1) * 128]
    acc_ref[...] = acc

    @pl.when(j == pl.num_programs(1) - 1)
    def _():
        sum_ref[...] = jnp.sum(acc_ref[...], axis=-1, keepdims=True)  # (1, C, 1)


def _apply_kernel(x_ref, alpha_ref, gate_ref, o_ref):
    # (1, C, tT) + (1, C, 1) then * (1, C, 1): pure VPU broadcasts, mem-bound.
    o_ref[...] = ((x_ref[...].astype(jnp.float32) + alpha_ref[...])
                  * gate_ref[...]).astype(o_ref.dtype)


# ------------------------------------ API ------------------------------------

def afms(x: jax.Array, alpha: jax.Array, weight: jax.Array, bias: jax.Array,
         *, tile_t: int | None = None, force_two_pass: bool = False) -> jax.Array:
    """AFMS forward.

    x:      (B, C, T)
    alpha:  (C, 1)    (nn.Parameter, broadcast add)
    weight: (C, C)    (nn.Linear.weight, [out, in])
    bias:   (C,)      (nn.Linear.bias)
    returns (B, C, T) with x's dtype
    """
    B, C, T = x.shape
    assert alpha.shape == (C, 1)
    assert weight.shape == (C, C)
    assert bias.shape == (C,)

    capacity = _vmem_capacity_bytes()
    vmem_limit = int(capacity) * 9 // 10
    t_lane = _round_up(T, 128)

    alpha3 = alpha.reshape(1, C, 1).astype(jnp.float32)

    # Fused-path footprint: 2x in + 2x out blocks (double-buffered) + weight.
    fused_bytes = 4 * C * t_lane * 4 + C * _round_up(C, 128) * 4 + (1 << 20)
    use_fused = (not force_two_pass) and fused_bytes <= (capacity * 2) // 5

    if use_fused:
        return pl.pallas_call(
            functools.partial(_fused_kernel, inv_t=1.0 / T),
            out_shape=jax.ShapeDtypeStruct((B, C, T), x.dtype),
            grid_spec=pltpu.PrefetchScalarGridSpec(
                num_scalar_prefetch=0,
                grid=(B,),
                in_specs=[
                    pl.BlockSpec((1, C, T), lambda b: (b, 0, 0)),
                    pl.BlockSpec((C, C), lambda b: (0, 0)),
                    pl.BlockSpec((C, 1), lambda b: (0, 0)),
                    pl.BlockSpec((1, C, 1), lambda b: (0, 0, 0)),
                ],
                out_specs=pl.BlockSpec((1, C, T), lambda b: (b, 0, 0)),
            ),
            compiler_params=pltpu.CompilerParams(
                dimension_semantics=("parallel",),
                vmem_limit_bytes=vmem_limit),
        )(x, weight.astype(jnp.float32),
          bias.reshape(C, 1).astype(jnp.float32), alpha3)

    # -------- two-pass fallback (T too large for a resident slab) --------
    if tile_t is None:
        # pass-2 footprint ~ 4 * C * tile_t * 4 bytes; target 1-2k lanes/step.
        max_by_vmem = max(128, (((capacity * 2) // 5) // (16 * C)) // 128 * 128)
        tile_t = min(2048, t_lane, max_by_vmem)
    assert tile_t % 128 == 0
    tile_t = min(tile_t, t_lane)
    n_t = pl.cdiv(T, tile_t)

    # ---- Pass 1: per-(b, c) sums over T (no pad, ragged tail masked) ----
    sums = pl.pallas_call(
        functools.partial(_sum_kernel, t_total=T, tile_t=tile_t),
        out_shape=jax.ShapeDtypeStruct((B, C, 1), jnp.float32),
        grid_spec=pltpu.PrefetchScalarGridSpec(
            num_scalar_prefetch=0,
            grid=(B, n_t),                       # reduction (time) axis last
            in_specs=[pl.BlockSpec((1, C, tile_t), lambda b, j: (b, 0, j))],
            out_specs=pl.BlockSpec((1, C, 1), lambda b, j: (b, 0, 0)),
            scratch_shapes=[pltpu.VMEM((1, C, 128), jnp.float32)],
        ),
        compiler_params=pltpu.CompilerParams(
            dimension_semantics=("parallel", "arbitrary"),
            vmem_limit_bytes=vmem_limit),
    )(x)

    # FC + sigmoid hoisted to plain JAX: one batched (B,C)@(C,C) GEMM, and the
    # (C, C) weight never occupies VMEM in the streaming passes.
    mean = sums[:, :, 0] * (1.0 / T)                                  # (B, C)
    gate = jax.nn.sigmoid(mean @ weight.T.astype(jnp.float32)
                          + bias.astype(jnp.float32))                 # (B, C)
    gate3 = gate.reshape(B, C, 1)

    # ---- Pass 2: out = (x + alpha) * gate (no pad; OOB stores masked) ----
    return pl.pallas_call(
        _apply_kernel,
        out_shape=jax.ShapeDtypeStruct((B, C, T), x.dtype),
        grid_spec=pltpu.PrefetchScalarGridSpec(
            num_scalar_prefetch=0,
            grid=(B, n_t),
            in_specs=[
                pl.BlockSpec((1, C, tile_t), lambda b, j: (b, 0, j)),
                pl.BlockSpec((1, C, 1), lambda b, j: (0, 0, 0)),
                pl.BlockSpec((1, C, 1), lambda b, j: (b, 0, 0)),
            ],
            out_specs=pl.BlockSpec((1, C, tile_t), lambda b, j: (b, 0, j)),
        ),
        compiler_params=pltpu.CompilerParams(
            dimension_semantics=("parallel", "parallel"),
            vmem_limit_bytes=vmem_limit),
    )(x, alpha3, gate3)


if __name__ == "__main__":
    key = jax.random.PRNGKey(0)
    k1, k2, k3, k4 = jax.random.split(key, 4)

    B, C, T = 2, 128, 300          # small shapes; T deliberately not a 128 multiple
    x = jax.random.normal(k1, (B, C, T), dtype=jnp.float32)
    alpha = 1.0 + 0.1 * jax.random.normal(k2, (C, 1), dtype=jnp.float32)
    weight = jax.random.normal(k3, (C, C), dtype=jnp.float32) / (C ** 0.5)
    bias = 0.1 * jax.random.normal(k4, (C,), dtype=jnp.float32)

    # Plain-JAX reference of the PyTorch forward.
    mean_ref = jnp.mean(x, axis=-1)                          # (B, C)
    gate_ref = jax.nn.sigmoid(mean_ref @ weight.T + bias)    # (B, C)
    ref = (x + alpha[None, :, :]) * gate_ref[:, :, None]     # (B, C, T)

    # Fused single-pass path (default for these shapes).
    out_fused = jax.block_until_ready(afms(x, alpha, weight, bias))
    assert out_fused.shape == (B, C, T)
    assert jnp.allclose(out_fused, ref, atol=2e-5, rtol=2e-5), "fused mismatch"

    # Two-pass fallback, tile_t=128 -> 3 time tiles: exercises cross-tile
    # lane-partial accumulation and the ragged-tail mask (300 = 2*128 + 44).
    out_2p = jax.block_until_ready(
        afms(x, alpha, weight, bias, tile_t=128, force_two_pass=True))
    assert out_2p.shape == (B, C, T)
    assert jnp.allclose(out_2p, ref, atol=2e-5, rtol=2e-5), "two-pass mismatch"

    print("KERNEL_OK")
</pallas_src>

<mosaic_0001>
module attributes {stable_mosaic.version = 11 : i64} {
  func.func @_fused_kernel(%arg0: i32, %arg1: memref<1x128x300xf32, #tpu.memory_space<vmem>>, %arg2: memref<128x128xf32, #tpu.memory_space<vmem>>, %arg3: memref<128x1xf32, #tpu.memory_space<vmem>>, %arg4: memref<1x128x1xf32, #tpu.memory_space<vmem>>, %arg5: memref<1x128x300xf32, #tpu.memory_space<vmem>>) attributes {dimension_semantics = [#tpu.dimension_semantics<parallel>], iteration_bounds = array<i64: 2>, scalar_prefetch = 0 : i64, scratch_operands = 0 : i64, tpu.core_type = #tpu.core_type<tc>, window_params = [{transform_indices = @transform_0, window_bounds = array<i64: 1, 128, 300>}, {pipeline_mode = #tpu.pipeline_mode<synchronous>, transform_indices = @transform_1, window_bounds = array<i64: 128, 128>}, {pipeline_mode = #tpu.pipeline_mode<synchronous>, transform_indices = @transform_2, window_bounds = array<i64: 128, 1>}, {pipeline_mode = #tpu.pipeline_mode<synchronous>, transform_indices = @transform_3, window_bounds = array<i64: 1, 128, 1>}, {transform_indices = @transform_4, window_bounds = array<i64: 1, 128, 300>}]} {
    %c0 = arith.constant 0 : index
    %c0_0 = arith.constant 0 : index
    %c0_1 = arith.constant 0 : index
    %0 = vector.load %arg1[%c0, %c0_0, %c0_1] : memref<1x128x300xf32, #tpu.memory_space<vmem>>, vector<1x128x300xf32>
    %cst = arith.constant dense<0.000000e+00> : vector<1x128xf32>
    %1 = vector.multi_reduction <add>, %0, %cst [2] : vector<1x128x300xf32> to vector<1x128xf32>
    %2 = vector.shape_cast %1 : vector<1x128xf32> to vector<1x128x1xf32>
    %3 = vector.shape_cast %2 : vector<1x128x1xf32> to vector<128x1xf32>
    %cst_2 = arith.constant 0.00333333341 : f32
    %4 = vector.broadcast %cst_2 : f32 to vector<128x1xf32>
    %5 = arith.mulf %3, %4 : vector<128x1xf32>
    %c0_3 = arith.constant 0 : index
    %c0_4 = arith.constant 0 : index
    %6 = vector.load %arg2[%c0_3, %c0_4] : memref<128x128xf32, #tpu.memory_space<vmem>>, vector<128x128xf32>
    %cst_5 = arith.constant dense<0.000000e+00> : vector<128x1xf32>
    %7 = tpu.matmul %6, %5, %cst_5 {dimension_numbers = #tpu.dot_dimension_numbers<[1], [0], [0], [1], [0, 0, 1, 1], [], []>} : vector<128x128xf32>, vector<128x1xf32>, vector<128x1xf32> -> vector<128x1xf32>
    %c0_6 = arith.constant 0 : index
    %c0_7 = arith.constant 0 : index
    %8 = vector.load %arg3[%c0_6, %c0_7] : memref<128x1xf32, #tpu.memory_space<vmem>>, vector<128x1xf32>
    %9 = arith.addf %7, %8 : vector<128x1xf32>
    %cst_8 = arith.constant 0.000000e+00 : f32
    %10 = vector.broadcast %cst_8 : f32 to vector<128x1xf32>
    %11 = arith.subf %10, %9 : vector<128x1xf32>
    %12 = math.exp %11 : vector<128x1xf32>
    %cst_9 = arith.constant 1.000000e+00 : f32
    %13 = vector.broadcast %cst_9 : f32 to vector<128x1xf32>
    %14 = arith.addf %13, %12 : vector<128x1xf32>
    %cst_10 = arith.constant 1.000000e+00 : f32
    %15 = vector.broadcast %cst_10 : f32 to vector<128x1xf32>
    %16 = arith.divf %15, %14 : vector<128x1xf32>
    %c0_11 = arith.constant 0 : index
    %c0_12 = arith.constant 0 : index
    %c0_13 = arith.constant 0 : index
    %17 = vector.load %arg1[%c0_11, %c0_12, %c0_13] : memref<1x128x300xf32, #tpu.memory_space<vmem>>, vector<1x128x300xf32>
    %c0_14 = arith.constant 0 : index
    %c0_15 = arith.constant 0 : index
    %c0_16 = arith.constant 0 : index
    %18 = vector.load %arg4[%c0_14, %c0_15, %c0_16] : memref<1x128x1xf32, #tpu.memory_space<vmem>>, vector<1x128x1xf32>
    %19 = vector.broadcast %18 : vector<1x128x1xf32> to vector<1x128x300xf32>
    %20 = arith.addf %17, %19 : vector<1x128x300xf32>
    %21 = vector.shape_cast %16 : vector<128x1xf32> to vector<1x128x1xf32>
    %22 = vector.broadcast %21 : vector<1x128x1xf32> to vector<1x128x300xf32>
    %23 = arith.mulf %20, %22 : vector<1x128x300xf32>
    %c0_17 = arith.constant 0 : index
    %c0_18 = arith.constant 0 : index
    %c0_19 = arith.constant 0 : index
    %24 = vector.load %arg5[%c0_17, %c0_18, %c0_19] : memref<1x128x300xf32, #tpu.memory_space<vmem>>, vector<1x128x300xf32>
    tpu.vector_store %arg5[%c0_17, %c0_18, %c0_19], %23 {strides = array<i32>} : memref<1x128x300xf32, #tpu.memory_space<vmem>>, vector<1x128x300xf32>,
    return
  }
  func.func @transform_0(%arg0: i32) -> (i32, i32, i32) {
    %c0_i32 = arith.constant 0 : i32
    %c0_i32_0 = arith.constant 0 : i32
    %c0_i32_1 = arith.constant 0 : i32
    return %arg0, %c0_i32, %c0_i32_0 : i32, i32, i32
  }
  func.func @transform_1(%arg0: i32) -> (i32, i32) {
    %c0_i32 = arith.constant 0 : i32
    %c0_i32_0 = arith.constant 0 : i32
    %c0_i32_1 = arith.constant 0 : i32
    return %c0_i32, %c0_i32_0 : i32, i32
  }
  func.func @transform_2(%arg0: i32) -> (i32, i32) {
    %c0_i32 = arith.constant 0 : i32
    %c0_i32_0 = arith.constant 0 : i32
    %c0_i32_1 = arith.constant 0 : i32
    return %c0_i32, %c0_i32_0 : i32, i32
  }
  func.func @transform_3(%arg0: i32) -> (i32, i32, i32) {
    %c0_i32 = arith.constant 0 : i32
    %c0_i32_0 = arith.constant 0 : i32
    %c0_i32_1 = arith.constant 0 : i32
    %c0_i32_2 = arith.constant 0 : i32
    return %c0_i32, %c0_i32_0, %c0_i32_1 : i32, i32, i32
  }
  func.func @transform_4(%arg0: i32) -> (i32, i32, i32) {
    %c0_i32 = arith.constant 0 : i32
    %c0_i32_0 = arith.constant 0 : i32
    %c0_i32_1 = arith.constant 0 : i32
    return %arg0, %c0_i32, %c0_i32_0 : i32, i32, i32
  }
}

</mosaic_0001>

<bundles_post_ra>
// kernel: tpu_custom_call.1
= control target key start
LH: loop header
LB: loop body
LE: loop exit
PB: predicated region body
PF: predicated region fallthrough
CT: control target
= control target key end

     0   :  { %s1335_s15 = smov 0   ;;  %s2034_s0 = inlined_call_operand.vmem [shape: f32[2,128,300], index: 0, kind: input, shape index: {}]   ;;  %s2035_s1 = inlined_call_operand.vmem [shape: f32[128,128], index: 1, kind: input, shape index: {}]   ;;  %s2036_s2 = inlined_call_operand.vmem [shape: f32[128,1], index: 2, kind: input, shape index: {}]   ;;  %s2037_s3 = inlined_call_operand.vmem [shape: f32[1,128,1], index: 3, kind: input, shape index: {}]   ;;  %s2038_s4 = inlined_call_operand.vmem [shape: f32[2,128,300], index: 4, kind: output, shape index: {}]  }
   0x1 LB: > { %s1119_s16 = sadd.s32 4294967295, %s1307_s15   ;;  %p1123_p0 = scmp.ge.s32.totalorder %s1307_s15, 1  ;;  %s1307_s15 = sphi %s1335_s15, %s14_s15  }
   0x2   : > { %p162_p1 = scmp.lt.s32.totalorder %s1307_s15, 3 }
   0x4   : > { %p163_p2 = pnand %p1123_p0, %p162_p1 }
   0x5   : > { %p188_p3 = scmp.lt.s32.totalorder (!%p163_p2), %s1119_s16, 1 }
   0x6   : > { %166 = sbr.rel (%p163_p2) target bundleno = 509 (0x1fd), region = 36 }
   0xb   : > { %s2054_s16 = smov (!%p188_p3, %s1119_s16), 1  ;;  %vm247_vm0 = vcmask 359424  }
   0xc   : > { %s1176_s17 = smul.u32 384, %s2054_s16 }
   0xe   : > { %s1351_s20 = scalar_lea.vmem %s2034_s0, %s1176_s17  ;;  %s1881_s5 = scalar_lea.vmem %s2038_s4, %s1176_s17 }
   0xf   : > { %v243_v0 = vld [vmem:[%s1351_s20 + $0x168] sm:$0xff]  ;;  %v244_v1 = vld [vmem:[%s1351_s20 + $0x170] sm:$0xff]  ;;  %v245_v2 = vld [vmem:[%s1351_s20 + $0x178] sm:$0xff] }
  0x10   : > { %v322_v3 = vadd.f32 %v244_v1, %v243_v0  ;;  %v323_v4 = vsel %vm247_vm0, %v245_v2, 0.0  ;;  %v237_v5 = vld [vmem:[%s1351_s20 + $0x138] sm:$0xff]  ;;  %v238_v6 = vld [vmem:[%s1351_s20 + $0x140] sm:$0xff]  ;;  %v239_v7 = vld [vmem:[%s1351_s20 + $0x148] sm:$0xff] }
  0x11   : > { %v312_v8 = vadd.f32 %v238_v6, %v237_v5  ;;  %v313_v9 = vsel %vm247_vm0, %v239_v7, 0.0  ;;  %v231_v10 = vld [vmem:[%s1351_s20 + $0x108] sm:$0xff]  ;;  %v232_v11 = vld [vmem:[%s1351_s20 + $0x110] sm:$0xff]  ;;  %v233_v12 = vld [vmem:[%s1351_s20 + $0x118] sm:$0xff] }
  0x12   : > { %v324_v13 = vadd.f32 %v323_v4, %v322_v3  ;;  %v302_v14 = vadd.f32 %v232_v11, %v231_v10  ;;  %v303_v15 = vsel %vm247_vm0, %v233_v12, 0.0  ;;  %v240_v16 = vld [vmem:[%s1351_s20 + $0x150] sm:$0xff]  ;;  %v241_v17 = vld [vmem:[%s1351_s20 + $0x158] sm:$0xff]  ;;  %v242_v18 = vld [vmem:[%s1351_s20 + $0x160] sm:$0xff] }
  0x13   : > { %v314_v19 = vadd.f32 %v313_v9, %v312_v8  ;;  %v234_v20 = vld [vmem:[%s1351_s20 + $0x120] sm:$0xff]  ;;  %v235_v21 = vld [vmem:[%s1351_s20 + $0x128] sm:$0xff]  ;;  %v236_v22 = vld [vmem:[%s1351_s20 + $0x130] sm:$0xff]  ;;  %v317_v24 = vadd.f32 %v241_v17, %v240_v16  ;;  %v318_v28 = vsel %vm247_vm0, %v242_v18, 0.0 }
  0x14   : > { %325 = vadd.xlane.f32.xlu0 %v324_v13  ;;  %v304_v23 = vadd.f32 %v303_v15, %v302_v14  ;;  %v228_v25 = vld [vmem:[%s1351_s20 + $0xf0] sm:$0xff]  ;;  %v229_v26 = vld [vmem:[%s1351_s20 + $0xf8] sm:$0xff]  ;;  %v230_v27 = vld [vmem:[%s1351_s20 + $0x100] sm:$0xff]  ;;  %v307_v29 = vadd.f32 %v235_v21, %v234_v20  ;;  %v308_v30 = vsel %vm247_vm0, %v236_v22, 0.0 }
  0x15   : > { %315 = vadd.xlane.f32.xlu1 %v314_v19  ;;  %v297_v31 = vadd.f32 %v229_v26, %v228_v25  ;;  %v298_v32 = vsel %vm247_vm0, %v230_v27, 0.0  ;;  %v319_v33 = vadd.f32 %v318_v28, %v317_v24  ;;  %v225_v35 = vld [vmem:[%s1351_s20 + $0xd8] sm:$0xff]  ;;  %v226_v36 = vld [vmem:[%s1351_s20 + $0xe0] sm:$0xff]  ;;  %v227_v38 = vld [vmem:[%s1351_s20 + $0xe8] sm:$0xff] }
  0x16   : > { %305 = vadd.xlane.f32.xlu2 %v304_v23  ;;  %v309_v34 = vadd.f32 %v308_v30, %v307_v29  ;;  %v222_v39 = vld [vmem:[%s1351_s20 + $0xc0] sm:$0xff]  ;;  %v223_v40 = vld [vmem:[%s1351_s20 + $0xc8] sm:$0xff]  ;;  %v224_v41 = vld [vmem:[%s1351_s20 + $0xd0] sm:$0xff]  ;;  %v292_v44 = vadd.f32 %v226_v36, %v225_v35  ;;  %v293_v46 = vsel %vm247_vm0, %v227_v38, 0.0 }
  0x17   : > { %v299_v37 = vadd.f32 %v298_v32, %v297_v31  ;;  %v219_v42 = vld [vmem:[%s1351_s20 + $0xa8] sm:$0xff]  ;;  %v220_v43 = vld [vmem:[%s1351_s20 + $0xb0] sm:$0xff]  ;;  %v221_v45 = vld [vmem:[%s1351_s20 + $0xb8] sm:$0xff]  ;;  %v287_v47 = vadd.f32 %v223_v40, %v222_v39  ;;  %v288_v48 = vsel %vm247_vm0, %v224_v41, 0.0 }
  0x18   : > { %v282_v49 = vadd.f32 %v220_v43, %v219_v42  ;;  %v283_v50 = vsel %vm247_vm0, %v221_v45, 0.0  ;;  %v294_v51 = vadd.f32 %v293_v46, %v292_v44  ;;  %v216_v53 = vld [vmem:[%s1351_s20 + $0x90] sm:$0xff]  ;;  %v217_v54 = vld [vmem:[%s1351_s20 + $0x98] sm:$0xff]  ;;  %v218_v56 = vld [vmem:[%s1351_s20 + $0xa0] sm:$0xff] }
  0x19   : > { %v289_v52 = vadd.f32 %v288_v48, %v287_v47  ;;  %v213_v57 = vld [vmem:[%s1351_s20 + $0x78] sm:$0xff]  ;;  %v214_v58 = vld [vmem:[%s1351_s20 + $0x80] sm:$0xff]  ;;  %v215_v59 = vld [vmem:[%s1351_s20 + $0x88] sm:$0xff]  ;;  %v277_v62 = vadd.f32 %v217_v54, %v216_v53  ;;  %v278_v0 = vsel %vm247_vm0, %v218_v56, 0.0 }
  0x1a   : > { %v284_v55 = vadd.f32 %v283_v50, %v282_v49  ;;  %v210_v60 = vld [vmem:[%s1351_s20 + $0x60] sm:$0xff]  ;;  %v211_v61 = vld [vmem:[%s1351_s20 + $0x68] sm:$0xff]  ;;  %v212_v63 = vld [vmem:[%s1351_s20 + $0x70] sm:$0xff]  ;;  %v272_v1 = vadd.f32 %v214_v58, %v213_v57  ;;  %v273_v2 = vsel %vm247_vm0, %v215_v59, 0.0 }
  0x1b   : > { %v267_v3 = vadd.f32 %v211_v61, %v210_v60  ;;  %v268_v4 = vsel %vm247_vm0, %v212_v63, 0.0  ;;  %v279_v5 = vadd.f32 %v278_v0, %v277_v62  ;;  %v207_v7 = vld [vmem:[%s1351_s20 + $0x48] sm:$0xff]  ;;  %v208_v8 = vld [vmem:[%s1351_s20 + $0x50] sm:$0xff]  ;;  %v209_v10 = vld [vmem:[%s1351_s20 + $0x58] sm:$0xff] }
  0x1c   : > { %320 = vadd.xlane.f32.xlu0 %v319_v33  ;;  %v274_v6 = vadd.f32 %v273_v2, %v272_v1  ;;  %v204_v11 = vld [vmem:[%s1351_s20 + $0x30] sm:$0xff]  ;;  %v205_v12 = vld [vmem:[%s1351_s20 + $0x38] sm:$0xff]  ;;  %v206_v13 = vld [vmem:[%s1351_s20 + $0x40] sm:$0xff]  ;;  %v262_v16 = vadd.f32 %v208_v8, %v207_v7  ;;  %v263_v18 = vsel %vm247_vm0, %v209_v10, 0.0  ;;  %v1309_v2 = vmov 0  }
  0x1d   : > { %310 = vadd.xlane.f32.xlu1 %v309_v34  ;;  %v269_v9 = vadd.f32 %v268_v4, %v267_v3  ;;  %v201_v14 = vld [vmem:[%s1351_s20 + $0x18] sm:$0xff]  ;;  %v202_v15 = vld [vmem:[%s1351_s20 + $0x20] sm:$0xff]  ;;  %v203_v17 = vld [vmem:[%s1351_s20 + $0x28] sm:$0xff]  ;;  %v257_v19 = vadd.f32 %v205_v12, %v204_v11  ;;  %v258_v20 = vsel %vm247_vm0, %v206_v13, 0.0  ;;  %1187 = vset.pattern.permute.xlu2 %v1309_v2 }
  0x1e   : > { %300 = vadd.xlane.f32.xlu2 %v299_v37  ;;  %v252_v21 = vadd.f32 %v202_v15, %v201_v14  ;;  %v253_v22 = vsel %vm247_vm0, %v203_v17, 0.0  ;;  %v264_v23 = vadd.f32 %v263_v18, %v262_v16  ;;  %v198_v25 = vld [vmem:[%s1351_s20] sm:$0xff]  ;;  %v199_v26 = vld [vmem:[%s1351_s20 + $0x8] sm:$0xff]  ;;  %v200_v28 = vld [vmem:[%s1351_s20 + $0x10] sm:$0xff]  ;;  %1186 = vset.pattern.permute.xlu1 %v1309_v2 }
  0x1f   : > { %v259_v24 = vadd.f32 %v258_v20, %v257_v19  ;;  %v246_v29 = vadd.f32 %v199_v26, %v198_v25  ;;  %v248_v30 = vsel %vm247_vm0, %v200_v28, 0.0  ;;  %v744_v62 = vld [vmem:[%s2037_s3] sm:$0xff]  ;;  %v745_v63 = vld [vmem:[%s2037_s3 + $0x8] sm:$0xff]  ;;  %v746_v7 = vld [vmem:[%s2037_s3 + $0x10] sm:$0xff]  ;;  %1188 = vset.pattern.permute.xlu0 %v1309_v2 }
  0x20   : > { %v254_v27 = vadd.f32 %v253_v22, %v252_v21  ;;  %v343_v3 = vld [vmem:[%s2035_s1] sm:$0xff]  ;;  %v344_v10 = vld [vmem:[%s2035_s1 + $0x8] sm:$0xff]  ;;  %v750_v15 = vld [vmem:[%s2037_s3 + $0x30] sm:$0xff] }
  0x21   : > { %v249_v31 = vadd.f32 %v248_v30, %v246_v29  ;;  %v347_v4 = vld [vmem:[%s2035_s1 + $0x20] sm:$0xff]  ;;  %v348_v11 = vld [vmem:[%s2035_s1 + $0x28] sm:$0xff]  ;;  %v345_v17 = vld [vmem:[%s2035_s1 + $0x10] sm:$0xff] }
  0x22   : > { %v748_v8 = vld [vmem:[%s2037_s3 + $0x20] sm:$0xff]  ;;  %v352_v12 = vld [vmem:[%s2035_s1 + $0x48] sm:$0xff]  ;;  %v349_v18 = vld [vmem:[%s2035_s1 + $0x30] sm:$0xff] }
  0x23   : > { %v356_v13 = vld [vmem:[%s2035_s1 + $0x68] sm:$0xff]  ;;  %v353_v19 = vld [vmem:[%s2035_s1 + $0x50] sm:$0xff]  ;;  %v756_v21 = vld [vmem:[%s2037_s3 + $0x60] sm:$0xff] }
  0x24   : > { %295 = vadd.xlane.f32.xlu0 %v294_v51  ;;  %v753_v14 = vld [vmem:[%s2037_s3 + $0x48] sm:$0xff]  ;;  %v357_v20 = vld [vmem:[%s2035_s1 + $0x70] sm:$0xff]  ;;  %v752_v22 = vld [vmem:[%s2037_s3 + $0x40] sm:$0xff] }
  0x25   : > { %290 = vadd.xlane.f32.xlu1 %v289_v52  ;;  %v749_v16 = vld [vmem:[%s2037_s3 + $0x28] sm:$0xff]  ;;  %v346_v25 = vld [vmem:[%s2035_s1 + $0x18] sm:$0xff]  ;;  %v754_v29 = vld [vmem:[%s2037_s3 + $0x50] sm:$0xff] }
  0x26   : > { %285 = vadd.xlane.f32.xlu2 %v284_v55  ;;  %v354_v26 = vld [vmem:[%s2035_s1 + $0x58] sm:$0xff]  ;;  %v758_v30 = vld [vmem:[%s2037_s3 + $0x70] sm:$0xff] }
  0x27   : > { %v755_v28 = vld [vmem:[%s2037_s3 + $0x58] sm:$0xff] }
  0x2c   : > { %280 = vadd.xlane.f32.xlu0 %v279_v5  ;;  %v351_v5 = vld [vmem:[%s2035_s1 + $0x40] sm:$0xff] }
  0x2d   : > { %275 = vadd.xlane.f32.xlu1 %v274_v6  ;;  %v355_v6 = vld [vmem:[%s2035_s1 + $0x60] sm:$0xff] }
  0x2e   : > { %270 = vadd.xlane.f32.xlu2 %v269_v9  ;;  %v747_v9 = vld [vmem:[%s2037_s3 + $0x18] sm:$0xff] }
  0x34   : > { %265 = vadd.xlane.f32.xlu0 %v264_v23  ;;  %v751_v23 = vld [vmem:[%s2037_s3 + $0x38] sm:$0xff] }
  0x35   : > { %260 = vadd.xlane.f32.xlu1 %v259_v24  ;;  %v350_v24 = vld [vmem:[%s2035_s1 + $0x38] sm:$0xff] }
  0x36   : > { %255 = vadd.xlane.f32.xlu2 %v254_v27  ;;  %v358_v27 = vld [vmem:[%s2035_s1 + $0x78] sm:$0xff] }
  0x3c   : > { %250 = vadd.xlane.f32.xlu0 %v249_v31  ;;  %v757_v31 = vld [vmem:[%s2037_s3 + $0x68] sm:$0xff] }
  0x4e   : > { %762 = vperm.xlu1 %1186, %v744_v62   ;;  %767 = vperm.xlu2 %1187, %v745_v63   ;;  %v368_v62 = vld [vmem:[%s2036_s2 + $0x48] sm:$0xff] }
  0x4f   : > { %v372_v63 = vld [vmem:[%s2036_s2 + $0x68] sm:$0xff] }
  0x50   : > { %772 = vperm.xlu0 %1188, %v746_v7  }
  0x56   : > { %782 = vperm.xlu1 %1186, %v748_v8   ;;  %777 = vperm.xlu2 %1187, %v747_v9  }
  0x58   : > { %807 = vperm.xlu0 %1188, %v753_v14  }
  0x5e   : > { %792 = vperm.xlu1 %1186, %v750_v15   ;;  %787 = vperm.xlu2 %1187, %v749_v16  }
  0x60   : > { %822 = vperm.xlu0 %1188, %v756_v21  }
  0x66   : > { %802 = vperm.xlu1 %1186, %v752_v22   ;;  %797 = vperm.xlu2 %1187, %v751_v23  }
  0x6e   : > { %817 = vperm.xlu1 %1186, %v755_v28   ;;  %812 = vperm.xlu2 %1187, %v754_v29   ;;  %v366_v29 = vld [vmem:[%s2036_s2 + $0x38] sm:$0xff] }
  0x76   : > { %832 = vperm.xlu1 %1186, %v758_v30   ;;  %827 = vperm.xlu2 %1187, %v757_v31   ;;  %v362_v30 = vld [vmem:[%s2036_s2 + $0x18] sm:$0xff] }
  0x87   : > { %v326_v32 = vpop.xlane.xlu0 %325 }
  0x88   : > { %v342_v33 = vmul.f32 0.0033333334, %v326_v32  ;;  %v316_v34 = vpop.xlane.xlu1 %315  ;;  %v759_v32 = vld [vmem:[%s2037_s3 + $0x78] sm:$0xff] }
  0x89   : > { %v306_v35 = vpop.xlane.xlu2 %305  ;;  %v340_v40 = vmul.f32 0.0033333334, %v316_v34  ;;  %837 = vperm.xlu0 %1188, %v759_v32   ;;  %v363_v34 = vld [vmem:[%s2036_s2 + $0x20] sm:$0xff] }
  0x8a   : > { %375 = vmatpush.msra.mxu0 %v342_v33  ;;  %1128 = vmatpush.msra.mxu1 %v342_v33  ;;  %v338_v42 = vmul.f32 0.0033333334, %v306_v35 }
  0x8b   : > { %1129 = vmatpush.msra.mxu2 %v342_v33  ;;  %1130 = vmatpush.msra.mxu3 %v342_v33  ;;  %v359_v33 = vld [vmem:[%s2036_s2] sm:$0xff] }
  0x8f   : > { %v321_v36 = vpop.xlane.xlu0 %320 }
  0x90   : > { %v341_v37 = vmul.f32 0.0033333334, %v321_v36  ;;  %v311_v38 = vpop.xlane.xlu1 %310 }
  0x91   : > { %v301_v39 = vpop.xlane.xlu2 %300  ;;  %v339_v41 = vmul.f32 0.0033333334, %v311_v38 }
  0x92   : > { %376 = vmatpush.msra.mxu0 %v341_v37  ;;  %1131 = vmatpush.msra.mxu1 %v341_v37  ;;  %v337_v44 = vmul.f32 0.0033333334, %v301_v39 }
  0x93   : > { %1132 = vmatpush.msra.mxu2 %v341_v37  ;;  %1133 = vmatpush.msra.mxu3 %v341_v37 }
  0x94   : > { %377 = vmatpush.msra.mxu0 %v340_v40  ;;  %1134 = vmatpush.msra.mxu1 %v340_v40 }
  0x95   : > { %1135 = vmatpush.msra.mxu2 %v340_v40  ;;  %1136 = vmatpush.msra.mxu3 %v340_v40 }
  0x96   : > { %378 = vmatpush.msra.mxu0 %v339_v41  ;;  %1137 = vmatpush.msra.mxu1 %v339_v41 }
  0x97   : > { %1138 = vmatpush.msra.mxu2 %v339_v41  ;;  %1139 = vmatpush.msra.mxu3 %v339_v41  ;;  %v296_v43 = vpop.xlane.xlu0 %295 }
  0x98   : > { %379 = vmatpush.msra.mxu0 %v338_v42  ;;  %1140 = vmatpush.msra.mxu1 %v338_v42  ;;  %v291_v45 = vpop.xlane.xlu1 %290  ;;  %v336_v47 = vmul.f32 0.0033333334, %v296_v43  ;;  %v367_v43 = vld [vmem:[%s2036_s2 + $0x40] sm:$0xff] }
  0x99   : > { %1141 = vmatpush.msra.mxu2 %v338_v42  ;;  %1142 = vmatpush.msra.mxu3 %v338_v42  ;;  %v286_v46 = vpop.xlane.xlu2 %285  ;;  %v335_v48 = vmul.f32 0.0033333334, %v291_v45  ;;  %v360_v45 = vld [vmem:[%s2036_s2 + $0x8] sm:$0xff] }
  0x9a   : > { %380 = vmatpush.msra.mxu0 %v337_v44  ;;  %1143 = vmatpush.msra.mxu1 %v337_v44  ;;  %v334_v49 = vmul.f32 0.0033333334, %v286_v46  ;;  %v364_v46 = vld [vmem:[%s2036_s2 + $0x28] sm:$0xff] }
  0x9b   : > { %1144 = vmatpush.msra.mxu2 %v337_v44  ;;  %1145 = vmatpush.msra.mxu3 %v337_v44  ;;  %v371_v44 = vld [vmem:[%s2036_s2 + $0x60] sm:$0xff] }
  0x9c   : > { %381 = vmatpush.msra.mxu0 %v336_v47  ;;  %1146 = vmatpush.msra.mxu1 %v336_v47 }
  0x9d   : > { %1147 = vmatpush.msra.mxu2 %v336_v47  ;;  %1148 = vmatpush.msra.mxu3 %v336_v47 }
  0x9e   : > { %382 = vmatpush.msra.mxu0 %v335_v48  ;;  %1149 = vmatpush.msra.mxu1 %v335_v48 }
  0x9f   : > { %1150 = vmatpush.msra.mxu2 %v335_v48  ;;  %1151 = vmatpush.msra.mxu3 %v335_v48  ;;  %v281_v50 = vpop.xlane.xlu0 %280 }
  0xa0   : > { %v333_v51 = vmul.f32 0.0033333334, %v281_v50  ;;  %383 = vmatpush.msra.mxu0 %v334_v49  ;;  %1152 = vmatpush.msra.mxu1 %v334_v49  ;;  %v276_v52 = vpop.xlane.xlu1 %275 }
  0xa1   : > { %1153 = vmatpush.msra.mxu2 %v334_v49  ;;  %1154 = vmatpush.msra.mxu3 %v334_v49  ;;  %v332_v53 = vmul.f32 0.0033333334, %v276_v52  ;;  %v271_v54 = vpop.xlane.xlu2 %270 }
  0xa2   : > { %384 = vmatpush.msra.mxu0 %v333_v51  ;;  %1155 = vmatpush.msra.mxu1 %v333_v51  ;;  %v331_v55 = vmul.f32 0.0033333334, %v271_v54 }
  0xa3   : > { %1156 = vmatpush.msra.mxu2 %v333_v51  ;;  %1157 = vmatpush.msra.mxu3 %v333_v51 }
  0xa4   : > { %385 = vmatpush.msra.mxu0 %v332_v53  ;;  %1158 = vmatpush.msra.mxu1 %v332_v53 }
  0xa5   : > { %1159 = vmatpush.msra.mxu2 %v332_v53  ;;  %1160 = vmatpush.msra.mxu3 %v332_v53 }
  0xa6   : > { %386 = vmatpush.msra.mxu0 %v331_v55  ;;  %1161 = vmatpush.msra.mxu1 %v331_v55 }
  0xa7   : > { %v266_v56 = vpop.xlane.xlu0 %265  ;;  %1162 = vmatpush.msra.mxu2 %v331_v55  ;;  %1163 = vmatpush.msra.mxu3 %v331_v55 }
  0xa8   : > { %v330_v57 = vmul.f32 0.0033333334, %v266_v56  ;;  %v261_v58 = vpop.xlane.xlu1 %260 }
  0xa9   : > { %v329_v59 = vmul.f32 0.0033333334, %v261_v58  ;;  %v256_v60 = vpop.xlane.xlu2 %255 }
  0xaa   : > { %387 = vmatpush.msra.mxu0 %v330_v57  ;;  %1164 = vmatpush.msra.mxu1 %v330_v57  ;;  %v328_v61 = vmul.f32 0.0033333334, %v256_v60 }
  0xab   : > { %1165 = vmatpush.msra.mxu2 %v330_v57  ;;  %1166 = vmatpush.msra.mxu3 %v330_v57 }
  0xac   : > { %388 = vmatpush.msra.mxu0 %v329_v59  ;;  %1167 = vmatpush.msra.mxu1 %v329_v59 }
  0xad   : > { %1168 = vmatpush.msra.mxu2 %v329_v59  ;;  %1169 = vmatpush.msra.mxu3 %v329_v59 }
  0xae   : > { %389 = vmatpush.msra.mxu0 %v328_v61  ;;  %1170 = vmatpush.msra.mxu1 %v328_v61 }
  0xaf   : > { %v251_v0 = vpop.xlane.xlu0 %250  ;;  %1171 = vmatpush.msra.mxu2 %v328_v61  ;;  %1172 = vmatpush.msra.mxu3 %v328_v61 }
  0xb0   : > { %v327_v1 = vmul.f32 0.0033333334, %v251_v0 }
  0xb2   : > { %390 = vmatpush.msra.mxu0 %v327_v1  ;;  %1173 = vmatpush.msra.mxu1 %v327_v1 }
  0xb3   : > { %1174 = vmatpush.msra.mxu2 %v327_v1  ;;  %1175 = vmatpush.msra.mxu3 %v327_v1 }
  0xb4   : > { %391 = vmatmul.f32.vlgmr.msra.gmra.mxu0 %v343_v3  ;;  %403 = vmatmul.f32.vlgmr.msra.gmra.mxu1 %v347_v4  ;;  %v361_v3 = vld [vmem:[%s2036_s2 + $0x10] sm:$0xff] }
  0xb5   : > { %415 = vmatmul.f32.vlgmr.msra.gmra.mxu2 %v351_v5  ;;  %427 = vmatmul.f32.vlgmr.msra.gmra.mxu3 %v355_v6  ;;  %v365_v4 = vld [vmem:[%s2036_s2 + $0x30] sm:$0xff] }
  0xbc   : > { %394 = vmatmul.f32.gmra.mxu0 %v344_v10  ;;  %406 = vmatmul.f32.gmra.mxu1 %v348_v11 }
  0xbd   : > { %418 = vmatmul.f32.gmra.mxu2 %v352_v12  ;;  %430 = vmatmul.f32.gmra.mxu3 %v356_v13 }
  0xc4   : > { %397 = vmatmul.f32.gmra.mxu0 %v345_v17  ;;  %409 = vmatmul.f32.gmra.mxu1 %v349_v18 }
  0xc5   : > { %421 = vmatmul.f32.gmra.mxu2 %v353_v19  ;;  %433 = vmatmul.f32.gmra.mxu3 %v357_v20 }
  0xcc   : > { %412 = vmatmul.f32.gmra.mxu1 %v350_v24  ;;  %400 = vmatmul.f32.gmra.mxu0 %v346_v25  ;;  %v369_v25 = vld [vmem:[%s2036_s2 + $0x50] sm:$0xff] }
  0xcd   : > { %424 = vmatmul.f32.gmra.mxu2 %v354_v26  ;;  %436 = vmatmul.f32.gmra.mxu3 %v358_v27  ;;  %v373_v26 = vld [vmem:[%s2036_s2 + $0x70] sm:$0xff] }
 0x131   : > { %v392_v35 = vpop.f32.mrf.mxu0  ;;  %v404_v36 = vpop.f32.mrf.mxu1 }
 0x132   : > { %v393_v37 = vadd.f32 %v392_v35, %v359_v33  ;;  %v405_v38 = vadd.f32 %v404_v36, %v363_v34 }
 0x134   : > { %v440_v39 = vsub.f32 0.0, %v393_v37  ;;  %v444_v40 = vsub.f32 0.0, %v405_v38 }
 0x136   : > { %v456_v41 = vmul.f32 1.442695, %v440_v39  ;;  %v464_v42 = vmul.f32 1.442695, %v444_v40 }
 0x138   : > { %1189 = vpow2.f32 %v456_v41  ;;  %v416_v47 = vpop.f32.mrf.mxu2  ;;  %v428_v48 = vpop.f32.mrf.mxu3 }
 0x139   : > { %1191 = vpow2.f32 %v464_v42  ;;  %v417_v49 = vadd.f32 %v416_v47, %v367_v43  ;;  %v395_v50 = vpop.f32.mrf.mxu0  ;;  %v407_v51 = vpop.f32.mrf.mxu1  ;;  %v429_v52 = vadd.f32 %v428_v48, %v371_v44 }
 0x13a   : > { %v396_v53 = vadd.f32 %v395_v50, %v360_v45  ;;  %v408_v54 = vadd.f32 %v407_v51, %v364_v46 }
 0x13b   : > { %v448_v55 = vsub.f32 0.0, %v417_v49  ;;  %v452_v58 = vsub.f32 0.0, %v429_v52 }
 0x13c   : > { %v441_v56 = vsub.f32 0.0, %v396_v53  ;;  %v445_v57 = vsub.f32 0.0, %v408_v54 }
 0x13d   : > { %v472_v59 = vmul.f32 1.442695, %v448_v55  ;;  %v480_v6 = vmul.f32 1.442695, %v452_v58 }
 0x13e   : > { %v1190_v60 = vpop.eup %1189  ;;  %v458_v61 = vmul.f32 1.442695, %v441_v56  ;;  %v466_v2 = vmul.f32 1.442695, %v445_v57 }
 0x13f   : > { %v1192_v0 = vpop.eup %1191  ;;  %v1537_v1 = vadd.f32 1.0, %v1190_v60  ;;  %1193 = vpow2.f32 %v472_v59 }
 0x140   : > { %v1545_v5 = vadd.f32 1.0, %v1192_v0  ;;  %1195 = vpow2.f32 %v458_v61  ;;  %v419_v7 = vpop.f32.mrf.mxu2  ;;  %v431_v8 = vpop.f32.mrf.mxu3 }
 0x141   : > { %1197 = vrcp.f32 %v1537_v1  ;;  %v420_v9 = vadd.f32 %v419_v7, %v368_v62  ;;  %v398_v10 = vpop.f32.mrf.mxu0  ;;  %v410_v11 = vpop.f32.mrf.mxu1  ;;  %v432_v12 = vadd.f32 %v431_v8, %v372_v63  ;;  %v515_v37 = vand.u32 2147483648, %v1537_v1  ;;  %v370_v62 = vld [vmem:[%s2036_s2 + $0x58] sm:$0xff] }
 0x142   : > { %1199 = vrcp.f32 %v1545_v5  ;;  %v399_v13 = vadd.f32 %v398_v10, %v361_v3  ;;  %v411_v14 = vadd.f32 %v410_v11, %v365_v4  ;;  %v575_v19 = vand.u32 2147483648, %v1545_v5 }
 0x143   : > { %1201 = vpow2.f32 %v466_v2  ;;  %v449_v15 = vsub.f32 0.0, %v420_v9  ;;  %v453_v16 = vsub.f32 0.0, %v432_v12  ;;  %vm569_vm1 = vweird.f32 %v1545_v5 }
 0x144   : > { %1203 = vpow2.f32 %v480_v6  ;;  %v442_v17 = vsub.f32 0.0, %v399_v13  ;;  %v446_v18 = vsub.f32 0.0, %v411_v14  ;;  %v573_v31 = vand.u32 2147483647, %v1545_v5 }
 0x145   : > { %v1194_v20 = vpop.eup %1193  ;;  %v474_v21 = vmul.f32 1.442695, %v449_v15  ;;  %v482_v33 = vmul.f32 1.442695, %v453_v16  ;;  %v1571_v36 = vor.u32 1.1754944e-38, %v575_v19  ;;  %vm509_vm2 = vweird.f32 %v1537_v1 }
 0x146   : > { %v1196_v22 = vpop.eup %1195  ;;  %v1550_v23 = vadd.f32 1.0, %v1194_v20  ;;  %v460_v24 = vmul.f32 1.442695, %v442_v17  ;;  %v468_v28 = vmul.f32 1.442695, %v446_v18  ;;  %vm1581_vm3 = vcmp.eq.f32.partialorder %v573_v31, 8.507059e+37 }
 0x147   : > { %v1558_v27 = vpop.eup %1197  ;;  %1205 = vpow2.f32 %v474_v21  ;;  %v1574_v39 = vadd.f32 1.0, %v1196_v22  ;;  %v513_v52 = vand.u32 2147483647, %v1537_v1  ;;  %v516_v60 = vor.u32 1.1754944e-38, %v515_v37 }
 0x148   : > { %v1568_v32 = vpop.eup %1199  ;;  %1207 = vrcp.f32 %v1550_v23  ;;  %v422_v34 = vpop.f32.mrf.mxu2  ;;  %v505_v51 = vmul.f32 %v1558_v27, %v1537_v1  ;;  %vm510_vm5 = vweird.f32 %v1558_v27  ;;  %vm629_vm6 = vweird.f32 %v1550_v23 }
 0x149   : > { %v434_v35 = vpop.f32.mrf.mxu3  ;;  %v1202_v38 = vpop.eup %1201  ;;  %v423_v40 = vadd.f32 %v422_v34, %v369_v25  ;;  %v565_v44 = vmul.f32 %v1568_v32, %v1545_v5  ;;  %1209 = vpow2.f32 %v460_v24  ;;  %vm570_vm4 = vweird.f32 %v1568_v32  ;;  %v374_v5 = vld [vmem:[%s2036_s2 + $0x78] sm:$0xff]  ;;  %vm511_vm9 = vmor %vm509_vm2, %vm510_vm5 }
 0x14a   : > { %v413_v41 = vpop.f32.mrf.mxu1  ;;  %v435_v42 = vadd.f32 %v434_v35, %v373_v26  ;;  %v401_v43 = vpop.f32.mrf.mxu0  ;;  %v1578_v46 = vadd.f32 1.0, %v1202_v38  ;;  %1211 = vpow2.f32 %v468_v28  ;;  %v506_v2 = vsub.f32 1.0, %v505_v51  ;;  %vm571_vm7 = vmor %vm569_vm1, %vm570_vm4 }
 0x14b   : > { %v1204_v45 = vpop.eup %1203  ;;  %v414_v47 = vadd.f32 %v413_v41, %v366_v29  ;;  %v402_v48 = vadd.f32 %v401_v43, %v362_v30  ;;  %v450_v49 = vsub.f32 0.0, %v423_v40  ;;  %v566_v56 = vsub.f32 1.0, %v565_v44 }
 0x14c   : > { %v1588_v53 = vadd.f32 1.0, %v1204_v45  ;;  %v454_v55 = vsub.f32 0.0, %v435_v42  ;;  %1213 = vrcp.f32 %v1574_v39  ;;  %v507_v13 = vmul.f32 %v1558_v27, %v506_v2 }
 0x14d   : > { %v447_v54 = vsub.f32 0.0, %v414_v47  ;;  %v1206_v57 = vpop.eup %1205  ;;  %v476_v58 = vmul.f32 1.442695, %v450_v49  ;;  %v443_v59 = vsub.f32 0.0, %v402_v48  ;;  %1215 = vrcp.f32 %v1578_v46 }
 0x14e   : > { %v1591_v61 = vpop.eup %1207  ;;  %1217 = vpow2.f32 %v482_v33  ;;  %v567_v0 = vmul.f32 %v1568_v32, %v566_v56  ;;  %v1602_v4 = vadd.f32 1.0, %v1206_v57  ;;  %v484_v6 = vmul.f32 1.442695, %v454_v55 }
 0x14f   : > { %v470_v63 = vmul.f32 1.442695, %v447_v54  ;;  %v1210_v3 = vpop.eup %1209  ;;  %1219 = vrcp.f32 %v1588_v53  ;;  %v625_v8 = vmul.f32 %v1591_v61, %v1550_v23  ;;  %v462_v11 = vmul.f32 1.442695, %v443_v59 }
 0x150   : > { %v425_v7 = vpop.f32.mrf.mxu2  ;;  %v1212_v9 = vpop.eup %1211  ;;  %1221 = vpow2.f32 %v476_v58  ;;  %v568_v12 = vadd.f32 %v1568_v32, %v567_v0  ;;  %vm630_vm8 = vweird.f32 %v1591_v61  ;;  %v633_v15 = vand.u32 2147483647, %v1550_v23 }
 0x151   : > { %v426_v10 = vadd.f32 %v425_v7, %v370_v62  ;;  %v626_v14 = vsub.f32 1.0, %v625_v8  ;;  %v1616_v17 = vadd.f32 1.0, %v1210_v3  ;;  %1223 = vpow2.f32 %v470_v63  ;;  %v437_v20 = vpop.f32.mrf.mxu3  ;;  %vm631_vm11 = vmor %vm629_vm6, %vm630_vm8 }
 0x152   : > { %v1614_v16 = vpop.eup %1213  ;;  %v572_v19 = vsel %vm571_vm7, %v1568_v32, %v568_v12  ;;  %v1624_v22 = vadd.f32 1.0, %v1212_v9  ;;  %v508_v25 = vadd.f32 %v1558_v27, %v507_v13  ;;  %1225 = vrcp.f32 %v1602_v4 }
 0x153   : > { %v451_v18 = vsub.f32 0.0, %v426_v10  ;;  %v1622_v21 = vpop.eup %1215  ;;  %v577_v24 = vsel %vm1581_vm3, %v1571_v36, %v572_v19  ;;  %v627_v26 = vmul.f32 %v1591_v61, %v626_v14  ;;  %vm514_vm10 = vcmp.eq.f32.partialorder %v513_v52, 8.507059e+37 }
 0x154   : > { %v1218_v28 = vpop.eup %1217  ;;  %910 = vperm.xlu1 %1186, %v577_v24   ;;  %v635_v30 = vand.u32 2147483648, %v1550_v23  ;;  %1227 = vpow2.f32 %v484_v6  ;;  %v512_v32 = vsel %vm511_vm9, %v1558_v27, %v508_v25  ;;  %v438_v34 = vadd.f32 %v437_v20, %v374_v5 }
 0x155   : > { %v478_v29 = vmul.f32 1.442695, %v451_v18  ;;  %v1637_v31 = vpop.eup %1219  ;;  %v628_v33 = vadd.f32 %v1591_v61, %v627_v26  ;;  %1229 = vrcp.f32 %v1616_v17  ;;  %v517_v36 = vsel %vm514_vm10, %v516_v60, %v512_v32 }
 0x156   : > { %v1222_v35 = vpop.eup %1221  ;;  %v636_v1 = vor.u32 1.1754944e-38, %v635_v30  ;;  %v520_v37 = vmul.f32 %v1614_v16, %v1574_v39  ;;  %1231 = vrcp.f32 %v1624_v22  ;;  %v1649_v38 = vadd.f32 1.0, %v1218_v28  ;;  %890 = vperm.xlu2 %1187, %v517_v36  }
 0x157   : > { %v632_v27 = vsel %vm631_vm11, %v1591_v61, %v628_v33  ;;  %vm634_vm12 = vcmp.eq.f32.partialorder %v633_v15, 8.507059e+37  ;;  %v1224_v40 = vpop.eup %1223  ;;  %1233 = vpow2.f32 %v478_v29  ;;  %v455_v42 = vsub.f32 0.0, %v438_v34 }
 0x158   : > { %v637_v41 = vsel %vm634_vm12, %v636_v1, %v632_v27  ;;  %v521_v43 = vsub.f32 1.0, %v520_v37  ;;  %v1652_v44 = vadd.f32 1.0, %v1222_v35  ;;  %1235 = vpow2.f32 %v462_v11  ;;  %v1655_v23 = vpop.eup %1225 }
 0x159   : > { %930 = vperm.xlu0 %1188, %v637_v41   ;;  %vm524_vm13 = vweird.f32 %v1574_v39  ;;  %vm525_vm14 = vweird.f32 %v1614_v16  ;;  %v528_v47 = vand.u32 2147483647, %v1574_v39  ;;  %v530_v48 = vand.u32 2147483648, %v1574_v39 }
 0x15a   : > { %v522_v45 = vmul.f32 %v1614_v16, %v521_v43  ;;  %v1228_v49 = vpop.eup %1227  ;;  %1237 = vrcp.f32 %v1649_v38  ;;  %v1662_v50 = vadd.f32 1.0, %v1224_v40  ;;  %v685_v51 = vmul.f32 %v1637_v31, %v1588_v53  ;;  %vm526_vm1 = vmor %vm524_vm13, %vm525_vm14 }
 0x15b   : > { %v1666_v52 = vpop.eup %1229  ;;  %v486_v54 = vmul.f32 1.442695, %v455_v42  ;;  %v531_v56 = vor.u32 1.1754944e-38, %v530_v48  ;;  %vm689_vm15 = vweird.f32 %v1588_v53  ;;  %vm690_vm2 = vweird.f32 %v1637_v31 }
 0x15c   : > { %v523_v55 = vadd.f32 %v1614_v16, %v522_v45  ;;  %v1670_v57 = vpop.eup %1231  ;;  %v686_v58 = vsub.f32 1.0, %v685_v51  ;;  %v693_v59 = vand.u32 2147483647, %v1588_v53  ;;  %v695_v60 = vand.u32 2147483648, %v1588_v53  ;;  %vm1691_vm4 = vmor %vm689_vm15, %vm690_vm2 }
 0x15d   : > { %v1234_v61 = vpop.eup %1233  ;;  %1239 = vrcp.f32 %v1652_v44  ;;  %vm529_vm3 = vcmp.eq.f32.partialorder %v528_v47, 8.507059e+37  ;;  %v580_v63 = vmul.f32 %v1622_v21, %v1578_v46  ;;  %v1682_v39 = vadd.f32 1.0, %v1228_v49 }
 0x15e   : > { %v527_v62 = vsel %vm526_vm1, %v1614_v16, %v523_v55  ;;  %v1236_v0 = vpop.eup %1235  ;;  %1241 = vrcp.f32 %v1662_v50  ;;  %v687_v3 = vmul.f32 %v1637_v31, %v686_v58  ;;  %v1685_v6 = vadd.f32 1.0, %v1234_v61 }
 0x15f   : > { %v532_v2 = vsel %vm529_vm3, %v531_v56, %v527_v62  ;;  %1243 = vpow2.f32 %v486_v54  ;;  %v696_v8 = vor.u32 1.1754944e-38, %v695_v60  ;;  %v581_v9 = vsub.f32 1.0, %v580_v63 }
 0x160   : > { %895 = vperm.xlu1 %1186, %v532_v2   ;;  %v1695_v10 = vpop.eup %1237  ;;  %v688_v11 = vadd.f32 %v1637_v31, %v687_v3  ;;  %vm694_vm5 = vcmp.eq.f32.partialorder %v693_v59, 8.507059e+37  ;;  %v590_v12 = vand.u32 2147483648, %v1578_v46  ;;  %v640_v13 = vmul.f32 %v1655_v23, %v1602_v4 }
 0x161   : > { %v582_v14 = vmul.f32 %v1622_v21, %v581_v9  ;;  %vm584_vm6 = vweird.f32 %v1578_v46  ;;  %vm585_vm7 = vweird.f32 %v1622_v21  ;;  %v588_v53 = vand.u32 2147483647, %v1578_v46 }
 0x162   : > { %1245 = vrcp.f32 %v1682_v39  ;;  %v1706_v15 = vadd.f32 1.0, %v1236_v0  ;;  %v692_v16 = vsel %vm1691_vm4, %v1637_v31, %v688_v11  ;;  %v641_v18 = vsub.f32 1.0, %v640_v13  ;;  %vm586_vm9 = vmor %vm584_vm6, %vm585_vm7 }
 0x163   : > { %v1711_v19 = vpop.eup %1239  ;;  %1247 = vrcp.f32 %v1685_v6  ;;  %v697_v5 = vsel %vm694_vm5, %v696_v8, %v692_v16  ;;  %v583_v20 = vadd.f32 %v1622_v21, %v582_v14  ;;  %vm644_vm8 = vweird.f32 %v1602_v4 }
 0x164   : > { %v1716_v24 = vpop.eup %1241  ;;  %950 = vperm.xlu2 %1187, %v697_v5   ;;  %v591_v46 = vor.u32 1.1754944e-38, %v590_v12  ;;  %v642_v25 = vmul.f32 %v1655_v23, %v641_v18  ;;  %vm645_vm10 = vweird.f32 %v1655_v23  ;;  %v535_v26 = vmul.f32 %v1666_v52, %v1616_v17 }
 0x165   : > { %v1244_v28 = vpop.eup %1243  ;;  %v587_v29 = vsel %vm586_vm9, %v1622_v21, %v583_v20  ;;  %vm589_vm11 = vcmp.eq.f32.partialorder %v588_v53, 8.507059e+37  ;;  %v648_v30 = vand.u32 2147483647, %v1602_v4  ;;  %v650_v31 = vand.u32 2147483648, %v1602_v4  ;;  %vm1730_vm12 = vmor %vm644_vm8, %vm645_vm10 }
 0x166   : > { %v592_v32 = vsel %vm589_vm11, %v591_v46, %v587_v29  ;;  %v643_v33 = vadd.f32 %v1655_v23, %v642_v25  ;;  %v536_v34 = vsub.f32 1.0, %v535_v26  ;;  %v543_v35 = vand.u32 2147483647, %v1616_v17 }
 0x167   : > { %1249 = vrcp.f32 %v1706_v15  ;;  %915 = vperm.xlu0 %1188, %v592_v32   ;;  %vm539_vm13 = vweird.f32 %v1616_v17  ;;  %v655_v21 = vmul.f32 %v1711_v19, %v1652_v44  ;;  %vm540_vm14 = vweird.f32 %v1666_v52 }
 0x168   : > { %v1737_v1 = vpop.eup %1245  ;;  %v647_v37 = vsel %vm1730_vm12, %v1655_v23, %v643_v33  ;;  %v537_v27 = vmul.f32 %v1666_v52, %v536_v34  ;;  %v545_v4 = vand.u32 2147483648, %v1616_v17  ;;  %v1747_v41 = vadd.f32 1.0, %v1244_v28  ;;  %vm541_vm2 = vmor %vm539_vm13, %vm540_vm14 }
 0x169   : > { %v1745_v40 = vpop.eup %1247  ;;  %v651_v42 = vor.u32 1.1754944e-38, %v650_v31  ;;  %v656_v43 = vsub.f32 1.0, %v655_v21  ;;  %v663_v45 = vand.u32 2147483647, %v1652_v44  ;;  %vm649_vm15 = vcmp.eq.f32.partialorder %v648_v30, 8.507059e+37 }
 0x16a   : > { %v538_v47 = vadd.f32 %v1666_v52, %v537_v27  ;;  %vm1751_vm1 = vcmp.eq.f32.partialorder %v543_v35, 8.507059e+37  ;;  %v665_v23 = vand.u32 2147483648, %v1652_v44  ;;  %vm660_vm3 = vweird.f32 %v1711_v19 }
 0x16b   : > { %v652_v49 = vsel %vm649_vm15, %v651_v42, %v647_v37  ;;  %v657_v51 = vmul.f32 %v1711_v19, %v656_v43  ;;  %v595_v54 = vmul.f32 %v1670_v57, %v1624_v22  ;;  %v546_v56 = vor.u32 1.1754944e-38, %v545_v4 }
 0x16c   : > { %935 = vperm.xlu2 %1187, %v652_v49   ;;  %v542_v55 = vsel %vm541_vm2, %v1666_v52, %v538_v47  ;;  %vm659_vm4 = vweird.f32 %v1652_v44  ;;  %v603_v58 = vand.u32 2147483647, %v1624_v22  ;;  %vm664_vm5 = vcmp.eq.f32.partialorder %v663_v45, 8.507059e+37 }
 0x16d   : > { %v1765_v59 = vpop.eup %1249  ;;  %v658_v17 = vadd.f32 %v1711_v19, %v657_v51  ;;  %v596_v60 = vsub.f32 1.0, %v595_v54  ;;  %v670_v61 = vmul.f32 %v1745_v40, %v1685_v6  ;;  %v547_v62 = vsel %vm1751_vm1, %v546_v56, %v542_v55  ;;  %vm661_vm6 = vmor %vm659_vm4, %vm660_vm3 }
 0x16e   : > { %v666_v63 = vor.u32 1.1754944e-38, %v665_v23  ;;  %vm599_vm7 = vweird.f32 %v1624_v22  ;;  %v605_v44 = vand.u32 2147483648, %v1624_v22  ;;  %vm600_vm8 = vweird.f32 %v1670_v57 }
 0x16f   : > { %900 = vperm.xlu0 %1188, %v547_v62   ;;  %v662_v52 = vsel %vm661_vm6, %v1711_v19, %v658_v17  ;;  %v597_v0 = vmul.f32 %v1670_v57, %v596_v60  ;;  %v671_v2 = vsub.f32 1.0, %v670_v61  ;;  %vm1777_vm9 = vcmp.eq.f32.partialorder %v603_v58, 8.507059e+37  ;;  %vm601_vm11 = vmor %vm599_vm7, %vm600_vm8 }
 0x170   : > { %v667_v3 = vsel %vm664_vm5, %v666_v63, %v662_v52  ;;  %v680_v8 = vand.u32 2147483648, %v1685_v6  ;;  %v610_v9 = vmul.f32 %v1716_v24, %v1662_v50  ;;  %vm675_vm10 = vweird.f32 %v1745_v40 }
 0x171   : > { %940 = vperm.xlu1 %1186, %v667_v3   ;;  %v598_v11 = vadd.f32 %v1670_v57, %v597_v0  ;;  %v672_v12 = vmul.f32 %v1745_v40, %v671_v2  ;;  %v678_v13 = vand.u32 2147483647, %v1685_v6  ;;  %v606_v14 = vor.u32 1.1754944e-38, %v605_v44 }
 0x172   : > { %vm674_vm12 = vweird.f32 %v1685_v6  ;;  %v611_v53 = vsub.f32 1.0, %v610_v9  ;;  %v618_v16 = vand.u32 2147483647, %v1662_v50  ;;  %vm614_vm13 = vweird.f32 %v1662_v50  ;;  %v1802_v6 = vpop.permute.xlu2 %767 }
 0x173   : > { %v602_v18 = vsel %vm601_vm11, %v1670_v57, %v598_v11  ;;  %v673_v19 = vadd.f32 %v1745_v40, %v672_v12  ;;  %v620_v5 = vand.u32 2147483648, %v1662_v50  ;;  %vm676_vm14 = vmor %vm674_vm12, %vm675_vm10  ;;  %v681_v22 = vor.u32 1.1754944e-38, %v680_v8  ;;  %v763_v8 = vpop.permute.xlu1 %762  ;;  %v1869_v12 = vpop.permute.xlu0 %772 }
 0x174   : > { %v607_v20 = vsel %vm1777_vm9, %v606_v14, %v602_v18  ;;  %v612_v46 = vmul.f32 %v1716_v24, %v611_v53  ;;  %vm615_vm15 = vweird.f32 %v1716_v24  ;;  %1251 = vrcp.f32 %v1747_v41 }
 0x175   : > { %920 = vperm.xlu2 %1187, %v607_v20   ;;  %v677_v57 = vsel %vm676_vm14, %v1745_v40, %v673_v19  ;;  %vm679_vm1 = vcmp.eq.f32.partialorder %v678_v13, 8.507059e+37  ;;  %vm619_vm2 = vcmp.eq.f32.partialorder %v618_v16, 8.507059e+37  ;;  %v550_v28 = vmul.f32 %v1765_v59, %v1706_v15  ;;  %vm616_vm3 = vmor %vm614_vm13, %vm615_vm15  ;;  %v1253_v16 = vld [vmem:[%s1351_s20] sm:$0xff]  ;;  %v1254_v19 = vld [vmem:[%s1351_s20 + $0x8] sm:$0xff] }
 0x176   : > { %v682_v25 = vsel %vm679_vm1, %v681_v22, %v677_v57  ;;  %v613_v26 = vadd.f32 %v1716_v24, %v612_v46  ;;  %v621_v29 = vor.u32 1.1754944e-38, %v620_v5  ;;  %vm554_vm4 = vweird.f32 %v1706_v15  ;;  %v1255_v20 = vld [vmem:[%s1351_s20 + $0x10] sm:$0xff] }
 0x177   : > { %945 = vperm.xlu0 %1188, %v682_v25   ;;  %v558_v30 = vand.u32 2147483647, %v1706_v15  ;;  %v560_v31 = vand.u32 2147483648, %v1706_v15  ;;  %v551_v33 = vsub.f32 1.0, %v550_v28  ;;  %vm555_vm5 = vweird.f32 %v1765_v59  ;;  %v1261_v15 = vld [vmem:[%s1351_s20 + $0xe0] sm:$0xff] }
 0x178   : > { %v617_v32 = vsel %vm616_vm3, %v1716_v24, %v613_v26  ;;  %v715_v34 = vmul.f32 %v1737_v1, %v1682_v39  ;;  %vm719_vm6 = vweird.f32 %v1682_v39  ;;  %vm720_vm7 = vweird.f32 %v1737_v1  ;;  %vm1823_vm8 = vmor %vm554_vm4, %vm555_vm5 }
 0x179   : > { %v622_v35 = vsel %vm619_vm2, %v621_v29, %v617_v32  ;;  %v552_v50 = vmul.f32 %v1765_v59, %v551_v33  ;;  %v723_v21 = vand.u32 2147483647, %v1682_v39  ;;  %v725_v37 = vand.u32 2147483648, %v1682_v39  ;;  %vm1837_vm12 = vmor %vm719_vm6, %vm720_vm7  ;;  %v1257_v33 = vld [vmem:[%s1351_s20 + $0x128] sm:$0xff] }
 0x17a   : > { %925 = vperm.xlu1 %1186, %v622_v35   ;;  %v716_v36 = vsub.f32 1.0, %v715_v34  ;;  %v1252_v24 = vpop.eup %1251  ;;  %vm559_vm9 = vcmp.eq.f32.partialorder %v558_v30, 8.507059e+37  ;;  %v561_v4 = vor.u32 1.1754944e-38, %v560_v31  ;;  %v700_v40 = vmul.f32 %v1695_v10, %v1649_v38  ;;  %v1848_v55 = vpop.permute.xlu2 %777  ;;  %v1256_v31 = vld [vmem:[%s1351_s20 + $0x120] sm:$0xff]  ;;  %v1258_v35 = vld [vmem:[%s1351_s20 + $0x130] sm:$0xff] }
 0x17b   : > { %v553_v42 = vadd.f32 %v1765_v59, %v552_v50  ;;  %vm704_vm10 = vweird.f32 %v1649_v38  ;;  %vm705_vm11 = vweird.f32 %v1695_v10  ;;  %v726_v45 = vor.u32 1.1754944e-38, %v725_v37  ;;  %v808_v53 = vpop.permute.xlu0 %807 }
 0x17c   : > { %v717_v43 = vmul.f32 %v1737_v1, %v716_v36  ;;  %v701_v47 = vsub.f32 1.0, %v700_v40  ;;  %v708_v48 = vand.u32 2147483647, %v1649_v38  ;;  %v710_v23 = vand.u32 2147483648, %v1649_v38  ;;  %vm706_vm14 = vmor %vm704_vm10, %vm705_vm11 }
 0x17d   : > { %v557_v49 = vsel %vm1823_vm8, %v1765_v59, %v553_v42  ;;  %vm724_vm13 = vcmp.eq.f32.partialorder %v723_v21, 8.507059e+37  ;;  %v730_v17 = vmul.f32 %v1252_v24, %v1747_v41  ;;  %vm734_vm1 = vweird.f32 %v1747_v41  ;;  %v1260_v42 = vld [vmem:[%s1351_s20 + $0xd8] sm:$0xff] }
 0x17e   : > { %v718_v51 = vadd.f32 %v1737_v1, %v717_v43  ;;  %v562_v54 = vsel %vm559_vm9, %v561_v4, %v557_v49  ;;  %v702_v39 = vmul.f32 %v1695_v10, %v701_v47  ;;  %v711_v58 = vor.u32 1.1754944e-38, %v710_v23  ;;  %v1259_v4 = vld [vmem:[%s1351_s20 + $0x60] sm:$0xff]  ;;  %v1262_v47 = vld [vmem:[%s1351_s20 + $0xe8] sm:$0xff] }
 0x17f   : > { %905 = vperm.xlu2 %1187, %v562_v54   ;;  %vm709_vm15 = vcmp.eq.f32.partialorder %v708_v48, 8.507059e+37  ;;  %v731_v61 = vsub.f32 1.0, %v730_v17  ;;  %vm735_vm2 = vweird.f32 %v1252_v24  ;;  %v738_v62 = vand.u32 2147483647, %v1747_v41  ;;  %v1263_v49 = vld [vmem:[%s1351_s20 + $0x68] sm:$0xff] }
 0x180   : > { %v722_v56 = vsel %vm1837_vm12, %v1737_v1, %v718_v51  ;;  %v703_v60 = vadd.f32 %v1695_v10, %v702_v39  ;;  %v740_v63 = vand.u32 2147483648, %v1747_v41  ;;  %vm736_vm3 = vmor %vm734_vm1, %vm735_vm2  ;;  %v840_v18 = vadd.f32 %v1253_v16, %v763_v8 }
 0x181   : > { %v727_v59 = vsel %vm724_vm13, %v726_v45, %v722_v56  ;;  %v732_v44 = vmul.f32 %v1252_v24, %v731_v61  ;;  %vm739_vm4 = vcmp.eq.f32.partialorder %v738_v62, 8.507059e+37  ;;  %v841_v5 = vadd.f32 %v1254_v19, %v763_v8  ;;  %v1264_v56 = vld [vmem:[%s1351_s20 + $0x70] sm:$0xff]  ;;  %v1265_v62 = vld [vmem:[%s1351_s20 + $0xc0] sm:$0xff] }
 0x182   : > { %960 = vperm.xlu0 %1188, %v727_v59   ;;  %v707_v1 = vsel %vm706_vm14, %v1695_v10, %v703_v60  ;;  %v741_v52 = vor.u32 1.1754944e-38, %v740_v63  ;;  %v1861_v7 = vpop.permute.xlu2 %787  ;;  %v783_v10 = vpop.permute.xlu1 %782  ;;  %v842_v22 = vadd.f32 %v1255_v20, %v763_v8  ;;  %v867_v43 = vadd.f32 %v1260_v42, %v808_v53  ;;  %v1270_v19 = vld [vmem:[%s1351_s20 + $0xa0] sm:$0xff]  ;;  %v1271_v20 = vld [vmem:[%s1351_s20 + $0x18] sm:$0xff] }
 0x183   : > { %v712_v38 = vsel %vm709_vm15, %v711_v58, %v707_v1  ;;  %v733_v0 = vadd.f32 %v1252_v24, %v732_v44  ;;  %v823_v29 = vpop.permute.xlu0 %822  ;;  %v852_v40 = vadd.f32 %v1259_v4, %v783_v10  ;;  %v868_v45 = vadd.f32 %v1261_v15, %v808_v53  ;;  %v1266_v1 = vld [vmem:[%s1351_s20 + $0xc8] sm:$0xff]  ;;  %v1278_v15 = vld [vmem:[%s1351_s20 + $0x80] sm:$0xff] }
 0x184   : > { %955 = vperm.xlu1 %1186, %v712_v38   ;;  %v876_v32 = vadd.f32 %v1256_v31, %v823_v29  ;;  %v877_v34 = vadd.f32 %v1257_v33, %v823_v29  ;;  %v878_v50 = vadd.f32 %v1258_v35, %v823_v29  ;;  %v869_v48 = vadd.f32 %v1262_v47, %v808_v53  ;;  %v1268_v53 = vld [vmem:[%s1351_s20 + $0x90] sm:$0xff] }
 0x185   : > { %v737_v2 = vsel %vm736_vm3, %v1252_v24, %v733_v0  ;;  %v853_v51 = vadd.f32 %v1263_v49, %v783_v10  ;;  %v854_v58 = vadd.f32 %v1264_v56, %v783_v10 }
 0x186   : > { %v742_v3 = vsel %vm739_vm4, %v741_v52, %v737_v2  ;;  %v1267_v52 = vld [vmem:[%s1351_s20 + $0xd0] sm:$0xff] }
 0x187   : > { %965 = vperm.xlu2 %1187, %v742_v3  }
 0x18a   : > { %v1863_v41 = vpop.permute.xlu2 %797  ;;  %v1867_v11 = vpop.permute.xlu1 %792 }
 0x18b   : > { %v1895_v27 = vpop.permute.xlu0 %837  ;;  %v858_v16 = vadd.f32 %v1268_v53, %v1867_v11 }
 0x192   : > { %v1865_v9 = vpop.permute.xlu2 %812  ;;  %v803_v14 = vpop.permute.xlu1 %802 }
 0x193   : > { %v864_v63 = vadd.f32 %v1265_v62, %v803_v14  ;;  %v865_v38 = vadd.f32 %v1266_v1, %v803_v14  ;;  %v866_v0 = vadd.f32 %v1267_v52, %v803_v14  ;;  %v1284_v52 = vld [vmem:[%s1351_s20 + $0x170] sm:$0xff] }
 0x19a   : > { %v1871_v13 = vpop.permute.xlu2 %827  ;;  %v1883_v28 = vpop.permute.xlu1 %817 }
 0x1a2   : > { %v1889_v30 = vpop.permute.xlu1 %832 }
 0x1b0   : > { %v891_v46 = vpop.permute.xlu2 %890 }
 0x1b1   : > { %v968_v57 = vmul.f32 %v891_v46, %v840_v18  ;;  %v969_v25 = vmul.f32 %v891_v46, %v841_v5  ;;  %v970_v26 = vmul.f32 %v891_v46, %v842_v22  ;;  %v1269_v18 = vld [vmem:[%s1351_s20 + $0x98] sm:$0xff]  ;;  %v860_v5 = vadd.f32 %v1270_v19, %v1867_v11 }
 0x1b2   : > { %v859_v14 = vadd.f32 %v1269_v18, %v1867_v11  ;;  %v843_v22 = vadd.f32 %v1271_v20, %v1802_v6  ;;  %v1273_v11 = vld [vmem:[%s1351_s20 + $0x28] sm:$0xff] }
 0x1b3   : > { %1016 = vst [vmem:[%s1881_s5] sm:$0xff] %v968_v57  ;;  %v1272_v57 = vld [vmem:[%s1351_s20 + $0x20] sm:$0xff] }
 0x1b4   : > { %1017 = vst [vmem:[%s1881_s5 + $0x8] sm:$0xff] %v969_v25  ;;  %v844_v25 = vadd.f32 %v1272_v57, %v1802_v6 }
 0x1b5   : > { %1018 = vst.msk [vmem:[%s1881_s5 + $0x10] sm:$0xff] %vm247_vm0, %v970_v26 }
 0x1be   : > { %v951_v36 = vpop.permute.xlu2 %950 }
 0x1bf   : > { %v1004_v21 = vmul.f32 %v951_v36, %v876_v32  ;;  %v1005_v37 = vmul.f32 %v951_v36, %v877_v34  ;;  %v1006_v24 = vmul.f32 %v951_v36, %v878_v50  ;;  %v845_v32 = vadd.f32 %v1273_v11, %v1802_v6  ;;  %v1274_v36 = vld [vmem:[%s1351_s20 + $0x78] sm:$0xff] }
 0x1c1   : > { %1052 = vst [vmem:[%s1881_s5 + $0x120] sm:$0xff] %v1004_v21  ;;  %v855_v21 = vadd.f32 %v1274_v36, %v1861_v7 }
 0x1c2   : > { %1053 = vst [vmem:[%s1881_s5 + $0x128] sm:$0xff] %v1005_v37  ;;  %v1275_v37 = vld [vmem:[%s1351_s20 + $0x48] sm:$0xff] }
 0x1c3   : > { %1054 = vst.msk [vmem:[%s1881_s5 + $0x130] sm:$0xff] %vm247_vm0, %v1006_v24  ;;  %v849_v6 = vadd.f32 %v1275_v37, %v1848_v55  ;;  %v1276_v24 = vld [vmem:[%s1351_s20 + $0x50] sm:$0xff] }
 0x1c4   : > { %v850_v4 = vadd.f32 %v1276_v24, %v1848_v55 }
 0x1c6   : > { %v911_v23 = vpop.permute.xlu1 %910  ;;  %v936_v54 = vpop.permute.xlu2 %935 }
 0x1c7   : > { %v980_v39 = vmul.f32 %v911_v23, %v852_v40  ;;  %v995_v17 = vmul.f32 %v936_v54, %v867_v43  ;;  %v996_v59 = vmul.f32 %v936_v54, %v868_v45  ;;  %v997_v60 = vmul.f32 %v936_v54, %v869_v48  ;;  %v1277_v40 = vld [vmem:[%s1351_s20 + $0x58] sm:$0xff] }
 0x1c8   : > { %v981_v61 = vmul.f32 %v911_v23, %v853_v51  ;;  %v982_v44 = vmul.f32 %v911_v23, %v854_v58  ;;  %v851_v42 = vadd.f32 %v1277_v40, %v1848_v55  ;;  %v856_v45 = vadd.f32 %v1278_v15, %v1861_v7  ;;  %v1279_v23 = vld [vmem:[%s1351_s20 + $0x88] sm:$0xff]  ;;  %v1280_v58 = vld [vmem:[%s1351_s20 + $0x30] sm:$0xff] }
 0x1c9   : > { %1028 = vst [vmem:[%s1881_s5 + $0x60] sm:$0xff] %v980_v39  ;;  %v857_v49 = vadd.f32 %v1279_v23, %v1861_v7 }
 0x1ca   : > { %1043 = vst [vmem:[%s1881_s5 + $0xd8] sm:$0xff] %v995_v17  ;;  %v846_v17 = vadd.f32 %v1280_v58, %v1869_v12  ;;  %v1299_v58 = vld [vmem:[%s1351_s20 + $0x140] sm:$0xff] }
 0x1cb   : > { %1044 = vst [vmem:[%s1881_s5 + $0xe0] sm:$0xff] %v996_v59  ;;  %v931_v2 = vpop.permute.xlu0 %930  ;;  %v1281_v59 = vld [vmem:[%s1351_s20 + $0x38] sm:$0xff] }
 0x1cc   : > { %1045 = vst.msk [vmem:[%s1881_s5 + $0xe8] sm:$0xff] %vm247_vm0, %v997_v60  ;;  %v992_v3 = vmul.f32 %v931_v2, %v864_v63  ;;  %v993_v8 = vmul.f32 %v931_v2, %v865_v38  ;;  %v994_v10 = vmul.f32 %v931_v2, %v866_v0  ;;  %v847_v7 = vadd.f32 %v1281_v59, %v1869_v12  ;;  %v1283_v38 = vld [vmem:[%s1351_s20 + $0x168] sm:$0xff]  ;;  %v1285_v2 = vld [vmem:[%s1351_s20 + $0x178] sm:$0xff] }
 0x1cd   : > { %1029 = vst [vmem:[%s1881_s5 + $0x68] sm:$0xff] %v981_v61  ;;  %v1282_v61 = vld [vmem:[%s1351_s20 + $0xf0] sm:$0xff]  ;;  %v886_v0 = vadd.f32 %v1284_v52, %v1895_v27  ;;  %v1300_v59 = vld [vmem:[%s1351_s20 + $0x148] sm:$0xff] }
 0x1ce   : > { %1030 = vst.msk [vmem:[%s1881_s5 + $0x70] sm:$0xff] %vm247_vm0, %v982_v44  ;;  %v870_v62 = vadd.f32 %v1282_v61, %v1865_v9  ;;  %v885_v44 = vadd.f32 %v1283_v38, %v1895_v27 }
 0x1cf   : > { %1040 = vst [vmem:[%s1881_s5 + $0xc0] sm:$0xff] %v992_v3  ;;  %v921_v46 = vpop.permute.xlu2 %920  ;;  %v887_v3 = vadd.f32 %v1285_v2, %v1895_v27  ;;  %v1288_v27 = vld [vmem:[%s1351_s20 + $0x40] sm:$0xff] }
 0x1d0   : > { %1041 = vst [vmem:[%s1881_s5 + $0xc8] sm:$0xff] %v993_v8  ;;  %v986_v26 = vmul.f32 %v921_v46, %v858_v16  ;;  %v987_v29 = vmul.f32 %v921_v46, %v859_v14  ;;  %v988_v31 = vmul.f32 %v921_v46, %v860_v5  ;;  %v1287_v14 = vld [vmem:[%s1351_s20 + $0x100] sm:$0xff]  ;;  %v848_v46 = vadd.f32 %v1288_v27, %v1869_v12 }
 0x1d1   : > { %1042 = vst.msk [vmem:[%s1881_s5 + $0xd0] sm:$0xff] %vm247_vm0, %v994_v10  ;;  %v1286_v10 = vld [vmem:[%s1351_s20 + $0xf8] sm:$0xff]  ;;  %v872_v19 = vadd.f32 %v1287_v14, %v1865_v9 }
 0x1d2   : > { %v896_v33 = vpop.permute.xlu1 %895  ;;  %1034 = vst [vmem:[%s1881_s5 + $0x90] sm:$0xff] %v986_v26  ;;  %v871_v53 = vadd.f32 %v1286_v10, %v1865_v9  ;;  %v1289_v26 = vld [vmem:[%s1351_s20 + $0x108] sm:$0xff]  ;;  %v1290_v9 = vld [vmem:[%s1351_s20 + $0x110] sm:$0xff] }
 0x1d3   : > { %v971_v34 = vmul.f32 %v896_v33, %v843_v22  ;;  %v972_v35 = vmul.f32 %v896_v33, %v844_v25  ;;  %1035 = vst [vmem:[%s1881_s5 + $0x98] sm:$0xff] %v987_v29  ;;  %v973_v50 = vmul.f32 %v896_v33, %v845_v32  ;;  %v873_v29 = vadd.f32 %v1289_v26, %v1883_v28 }
 0x1d4   : > { %1036 = vst.msk [vmem:[%s1881_s5 + $0xa0] sm:$0xff] %vm247_vm0, %v988_v31  ;;  %v874_v31 = vadd.f32 %v1290_v9, %v1883_v28 }
 0x1d5   : > { %1019 = vst [vmem:[%s1881_s5 + $0x18] sm:$0xff] %v971_v34  ;;  %v1291_v34 = vld [vmem:[%s1351_s20 + $0xa8] sm:$0xff] }
 0x1d6   : > { %1020 = vst [vmem:[%s1881_s5 + $0x20] sm:$0xff] %v972_v35  ;;  %v861_v35 = vadd.f32 %v1291_v34, %v1863_v41 }
 0x1d7   : > { %1021 = vst.msk [vmem:[%s1881_s5 + $0x28] sm:$0xff] %vm247_vm0, %v973_v50  ;;  %v1292_v50 = vld [vmem:[%s1351_s20 + $0xb0] sm:$0xff] }
 0x1d8   : > { %v862_v36 = vadd.f32 %v1292_v50, %v1863_v41 }
 0x1d9   : > { %v916_v43 = vpop.permute.xlu0 %915  ;;  %v906_v47 = vpop.permute.xlu2 %905 }
 0x1da   : > { %v983_v48 = vmul.f32 %v916_v43, %v855_v21  ;;  %v977_v51 = vmul.f32 %v906_v47, %v849_v6  ;;  %v978_v54 = vmul.f32 %v906_v47, %v850_v4  ;;  %v979_v39 = vmul.f32 %v906_v47, %v851_v42  ;;  %v1293_v21 = vld [vmem:[%s1351_s20 + $0xb8] sm:$0xff] }
 0x1db   : > { %v984_v56 = vmul.f32 %v916_v43, %v856_v45  ;;  %v985_v55 = vmul.f32 %v916_v43, %v857_v49  ;;  %v863_v37 = vadd.f32 %v1293_v21, %v1863_v41  ;;  %v1294_v6 = vld [vmem:[%s1351_s20 + $0x118] sm:$0xff]  ;;  %v1295_v41 = vld [vmem:[%s1351_s20 + $0x150] sm:$0xff] }
 0x1dc   : > { %1031 = vst [vmem:[%s1881_s5 + $0x78] sm:$0xff] %v983_v48  ;;  %v875_v24 = vadd.f32 %v1294_v6, %v1883_v28  ;;  %v882_v28 = vadd.f32 %v1295_v41, %v1889_v30  ;;  %v1296_v45 = vld [vmem:[%s1351_s20 + $0x158] sm:$0xff]  ;;  %v1297_v48 = vld [vmem:[%s1351_s20 + $0x160] sm:$0xff] }
 0x1dd   : > { %1025 = vst [vmem:[%s1881_s5 + $0x48] sm:$0xff] %v977_v51  ;;  %v883_v47 = vadd.f32 %v1296_v45, %v1889_v30  ;;  %v884_v23 = vadd.f32 %v1297_v48, %v1889_v30 }
 0x1de   : > { %1026 = vst [vmem:[%s1881_s5 + $0x50] sm:$0xff] %v978_v54 }
 0x1df   : > { %1027 = vst.msk [vmem:[%s1881_s5 + $0x58] sm:$0xff] %vm247_vm0, %v979_v39 }
 0x1e0   : > { %1032 = vst [vmem:[%s1881_s5 + $0x80] sm:$0xff] %v984_v56  ;;  %v1298_v56 = vld [vmem:[%s1351_s20 + $0x138] sm:$0xff] }
 0x1e1   : > { %1033 = vst.msk [vmem:[%s1881_s5 + $0x88] sm:$0xff] %vm247_vm0, %v985_v55  ;;  %v901_v60 = vpop.permute.xlu0 %900  ;;  %v966_v16 = vpop.permute.xlu2 %965  ;;  %v879_v55 = vadd.f32 %v1298_v56, %v1871_v13 }
 0x1e2   : > { %v974_v63 = vmul.f32 %v901_v60, %v846_v17  ;;  %v975_v1 = vmul.f32 %v901_v60, %v847_v7  ;;  %v1013_v5 = vmul.f32 %v966_v16, %v885_v44  ;;  %v1014_v20 = vmul.f32 %v966_v16, %v886_v0 }
 0x1e3   : > { %v941_v8 = vpop.permute.xlu1 %940  ;;  %v1015_v22 = vmul.f32 %v966_v16, %v887_v3  ;;  %v976_v11 = vmul.f32 %v901_v60, %v848_v46  ;;  %v880_v17 = vadd.f32 %v1299_v58, %v1871_v13  ;;  %v881_v7 = vadd.f32 %v1300_v59, %v1871_v13 }
 0x1e4   : > { %v998_v18 = vmul.f32 %v941_v8, %v870_v62  ;;  %1022 = vst [vmem:[%s1881_s5 + $0x30] sm:$0xff] %v974_v63  ;;  %v999_v57 = vmul.f32 %v941_v8, %v871_v53  ;;  %v1000_v25 = vmul.f32 %v941_v8, %v872_v19 }
 0x1e5   : > { %1023 = vst [vmem:[%s1881_s5 + $0x38] sm:$0xff] %v975_v1 }
 0x1e6   : > { %1046 = vst [vmem:[%s1881_s5 + $0xf0] sm:$0xff] %v998_v18 }
 0x1e7   : > { %1061 = vst [vmem:[%s1881_s5 + $0x168] sm:$0xff] %v1013_v5 }
 0x1e8   : > { %1062 = vst [vmem:[%s1881_s5 + $0x170] sm:$0xff] %v1014_v20 }
 0x1e9   : > { %1063 = vst.msk [vmem:[%s1881_s5 + $0x178] sm:$0xff] %vm247_vm0, %v1015_v22  ;;  %v946_v12 = vpop.permute.xlu0 %945 }
 0x1ea   : > { %1047 = vst [vmem:[%s1881_s5 + $0xf8] sm:$0xff] %v999_v57  ;;  %v1001_v32 = vmul.f32 %v946_v12, %v873_v29  ;;  %v1002_v33 = vmul.f32 %v946_v12, %v874_v31  ;;  %v1003_v15 = vmul.f32 %v946_v12, %v875_v24 }
 0x1eb   : > { %1048 = vst.msk [vmem:[%s1881_s5 + $0x100] sm:$0xff] %vm247_vm0, %v1000_v25 }
 0x1ec   : > { %1024 = vst.msk [vmem:[%s1881_s5 + $0x40] sm:$0xff] %vm247_vm0, %v976_v11  ;;  %v926_v4 = vpop.permute.xlu1 %925 }
 0x1ed   : > { %v989_v40 = vmul.f32 %v926_v4, %v861_v35  ;;  %v990_v42 = vmul.f32 %v926_v4, %v862_v36  ;;  %v991_v43 = vmul.f32 %v926_v4, %v863_v37  ;;  %1049 = vst [vmem:[%s1881_s5 + $0x108] sm:$0xff] %v1001_v32 }
 0x1ee   : > { %1050 = vst [vmem:[%s1881_s5 + $0x110] sm:$0xff] %v1002_v33 }
 0x1ef   : > { %1037 = vst [vmem:[%s1881_s5 + $0xa8] sm:$0xff] %v989_v40 }
 0x1f0   : > { %1038 = vst [vmem:[%s1881_s5 + $0xb0] sm:$0xff] %v990_v42 }
 0x1f1   : > { %1039 = vst.msk [vmem:[%s1881_s5 + $0xb8] sm:$0xff] %vm247_vm0, %v991_v43 }
 0x1f2   : > { %1051 = vst.msk [vmem:[%s1881_s5 + $0x118] sm:$0xff] %vm247_vm0, %v1003_v15 }
 0x1f4   : > { %v961_v49 = vpop.permute.xlu0 %960 }
 0x1f5   : > { %v1010_v51 = vmul.f32 %v961_v49, %v882_v28  ;;  %v1011_v54 = vmul.f32 %v961_v49, %v883_v47  ;;  %v1012_v39 = vmul.f32 %v961_v49, %v884_v23 }
 0x1f6   : > { %v956_v60 = vpop.permute.xlu1 %955 }
 0x1f7   : > { %1058 = vst [vmem:[%s1881_s5 + $0x150] sm:$0xff] %v1010_v51  ;;  %v1007_v30 = vmul.f32 %v956_v60, %v879_v55  ;;  %v1008_v61 = vmul.f32 %v956_v60, %v880_v17  ;;  %v1009_v62 = vmul.f32 %v956_v60, %v881_v7 }
 0x1f8   : > { %1059 = vst [vmem:[%s1881_s5 + $0x158] sm:$0xff] %v1011_v54 }
 0x1f9   : > { %1060 = vst.msk [vmem:[%s1881_s5 + $0x160] sm:$0xff] %vm247_vm0, %v1012_v39 }
 0x1fa   : > { %1055 = vst [vmem:[%s1881_s5 + $0x138] sm:$0xff] %v1007_v30 }
 0x1fb   : > { %1056 = vst [vmem:[%s1881_s5 + $0x140] sm:$0xff] %v1008_v61 }
 0x1fc   : > { %1057 = vst.msk [vmem:[%s1881_s5 + $0x148] sm:$0xff] %vm247_vm0, %v1009_v62 }
 0x1fd PF: > { %s14_s15 = sadd.s32 1, %s1307_s15  }
 0x1fe   : > { %p11_p4 = scmp.ge.s32.totalorder %s14_s15, 4  }
 0x200   :  { %13 = sbr.rel (!%p11_p4) target bundleno = 1 (0x1), region = 66 }

</bundles_post_ra>
